<compile_context>
chip_gen: v7x
topology: tpu7x:2x2x1
jax: 0.10.0
libtpu: 0.0.40
codegen_flags: <defaults>
</compile_context>

<pallas_src>
import functools

import jax
import jax.numpy as jnp
from jax.experimental import pallas as pl
from jax.experimental.pallas import tpu as pltpu


# ---------------------------------------------------------------------------
# Kernels
# ---------------------------------------------------------------------------
def _resident_kernel(x_ref, o_ref, *, inv_total):
    """Single-read path: x resident in VMEM; sum, subtract, write out."""
    xf = x_ref[...].astype(jnp.float32)            # cast once, reused
    mean = jnp.sum(xf) * inv_total
    o_ref[...] = (xf - mean).astype(o_ref.dtype)


def _partial_sum_kernel(x_ref, sum_ref, *, rows, lanes, tile_rows, tile_lanes,
                        num_row_tiles, num_lane_tiles, tiles_per_core,
                        need_row_mask, need_lane_mask, has_tail):
    """Per-core partial sum.

    Grid = (num_cores["parallel"], tiles_per_core["arbitrary"],
    num_lane_tiles["arbitrary"]). Each core owns a resident, lane-dense
    (8, 128) f32 accumulator block; every element holds the running partial
    sum, so each tile update is a single unmasked VPU vreg add.
    """
    c = pl.program_id(0)
    i = pl.program_id(1)
    j = pl.program_id(2)
    tile_r = c * tiles_per_core + i

    @pl.when(jnp.logical_and(i == 0, j == 0))
    def _():
        sum_ref[...] = jnp.zeros_like(sum_ref)

    def accumulate(mask_rows, mask_lanes):
        xf = x_ref[...].astype(jnp.float32)        # cast once, reused
        keep = None
        if mask_rows:
            ridx = tile_r * tile_rows + jax.lax.broadcasted_iota(
                jnp.int32, xf.shape, 0)
            keep = ridx < rows
        if mask_lanes:
            lidx = j * tile_lanes + jax.lax.broadcasted_iota(
                jnp.int32, xf.shape, 1)
            lmask = lidx < lanes
            keep = lmask if keep is None else jnp.logical_and(keep, lmask)
        if keep is not None:
            xf = jnp.where(keep, xf, 0.0)
        sum_ref[...] = sum_ref[...] + jnp.sum(xf)

    # Only duplicate tail tiles (odd tile count split over 2 cores) need the
    # validity guard, and only the last row/lane tile needs a mask.
    valid = (tile_r < num_row_tiles) if has_tail else None

    def guarded(cond):
        if valid is None:
            return cond
        return jnp.logical_and(valid, cond)

    if not (need_row_mask or need_lane_mask):
        if valid is None:
            accumulate(False, False)
        else:
            @pl.when(valid)
            def _():
                accumulate(False, False)
    else:
        edge = None
        if need_row_mask:
            edge = tile_r == num_row_tiles - 1
        if need_lane_mask:
            lane_edge = j == num_lane_tiles - 1
            edge = lane_edge if edge is None else jnp.logical_or(edge, lane_edge)

        @pl.when(guarded(jnp.logical_not(edge)))
        def _():
            accumulate(False, False)               # interior tiles: no mask

        @pl.when(guarded(edge))
        def _():
            accumulate(need_row_mask, need_lane_mask)


def _subtract_kernel(sums_ref, x_ref, o_ref, *, inv_total, num_cores):
    """o = x - mean; mean from the per-core partial sums held in SMEM."""
    s = sums_ref[0, 0]
    for k in range(1, num_cores):
        s = s + sums_ref[k * 8, 0]
    mean = s * inv_total
    o_ref[...] = (x_ref[...].astype(jnp.float32) - mean).astype(o_ref.dtype)


# ---------------------------------------------------------------------------
# Wrapper
# ---------------------------------------------------------------------------
def _to_2d(x: jax.Array) -> jax.Array:
    """Reshape to a lane-dense 2-D slab (rows, lanes); zero-copy for contiguous x."""
    if x.ndim == 0:
        return x.reshape(1, 1)
    if x.ndim == 1:
        return x.reshape(1, x.shape[0])
    if x.ndim == 4:
        n, c, h, w = x.shape
        return x.reshape(n * c, h * w)
    lead = 1
    for d in x.shape[:-1]:
        lead *= d
    return x.reshape(lead, x.shape[-1])


def _vmem_capacity_bytes() -> int:
    try:
        cap = getattr(pltpu.get_tpu_info(), "vmem_capacity_bytes", None)
        if cap:
            return int(cap)
    except Exception:
        pass
    return 64 * 1024 * 1024                        # conservative (v7x-sized)


def center_lay(x: jax.Array, *, target_tile_bytes=None,
               force_tiled: bool = False) -> jax.Array:
    """Forward pass of CenterLay: x - x.mean(), elementwise, same shape/dtype."""
    orig_shape = x.shape
    orig_dtype = x.dtype

    x2d = _to_2d(x)
    rows, lanes = x2d.shape
    total = rows * lanes
    if total == 0:
        return x
    itemsize = jnp.dtype(orig_dtype).itemsize
    size_bytes = total * itemsize
    inv_total = 1.0 / float(total)

    # ---- generation-aware budgets (v5e/v6e: 128 MiB VMEM, v7x: 64 MiB) -----
    vmem_cap = _vmem_capacity_bytes()
    if vmem_cap >= 96 * 1024 * 1024:
        vmem_limit = 96 * 1024 * 1024
        default_tile = 8 * 1024 * 1024
    else:
        vmem_limit = 48 * 1024 * 1024
        default_tile = 4 * 1024 * 1024
    if target_tile_bytes is None:
        target_tile_bytes = default_tile

    # ---- Path A: whole tensor (+ f32 temporaries) resident in VMEM ---------
    # Budget: in buffer + out buffer + ~2 full f32 temps + 1 MiB headroom.
    resident_need = 2 * size_bytes + 2 * total * 4 + (1 << 20)
    if (not force_tiled) and resident_need <= vmem_limit:
        out2d = pl.pallas_call(
            functools.partial(_resident_kernel, inv_total=inv_total),
            out_shape=jax.ShapeDtypeStruct((rows, lanes), orig_dtype),
            compiler_params=pltpu.CompilerParams(vmem_limit_bytes=vmem_limit),
            cost_estimate=pl.CostEstimate(
                flops=2 * total, transcendentals=0,
                bytes_accessed=2 * size_bytes),
        )(x2d)
        return out2d.reshape(orig_shape)

    # ---- Path B: streaming two-pass -----------------------------------------
    # Tile selection: full lane extent + row tiles when possible; lane-tiling
    # fallback for very wide last dims. row_align = 8/16/32 for 4/2/1-byte
    # dtypes (sublane packing).
    row_align = 8 * max(1, 4 // itemsize)
    lane_align = 128
    if lanes * itemsize * row_align <= target_tile_bytes:
        tile_lanes = lanes
        max_rows = target_tile_bytes // (lanes * itemsize)
        tile_rows = rows if rows <= max_rows else (max_rows // row_align) * row_align
    else:
        tile_rows = row_align if rows > row_align else rows
        max_l = target_tile_bytes // (tile_rows * itemsize)
        tile_lanes = max(lane_align, (max_l // lane_align) * lane_align)

    num_row_tiles = pl.cdiv(rows, tile_rows)
    num_lane_tiles = pl.cdiv(lanes, tile_lanes)
    need_row_mask = (rows % tile_rows) != 0
    need_lane_mask = (lanes % tile_lanes) != 0

    # Split row tiles across (up to) two TensorCores for the reduction pass.
    num_cores = 2 if num_row_tiles >= 2 else 1
    tiles_per_core = pl.cdiv(num_row_tiles, num_cores)
    has_tail = num_cores * tiles_per_core > num_row_tiles

    if has_tail:
        def x_index_p1(c, i, j):
            # Clamp so the tail duplicate step never DMAs out of bounds; its
            # contribution is skipped inside the kernel.
            return (jnp.minimum(c * tiles_per_core + i, num_row_tiles - 1), j)
    else:
        def x_index_p1(c, i, j):
            return (c * tiles_per_core + i, j)

    # ---------------- Pass 1: per-core partial sums -------------------------
    sums = pl.pallas_call(
        functools.partial(
            _partial_sum_kernel, rows=rows, lanes=lanes,
            tile_rows=tile_rows, tile_lanes=tile_lanes,
            num_row_tiles=num_row_tiles, num_lane_tiles=num_lane_tiles,
            tiles_per_core=tiles_per_core,
            need_row_mask=need_row_mask, need_lane_mask=need_lane_mask,
            has_tail=has_tail),
        out_shape=jax.ShapeDtypeStruct((num_cores * 8, 128), jnp.float32),
        grid=(num_cores, tiles_per_core, num_lane_tiles),
        in_specs=[pl.BlockSpec((tile_rows, tile_lanes), x_index_p1)],
        out_specs=pl.BlockSpec((8, 128), lambda c, i, j: (c, 0)),
        compiler_params=pltpu.CompilerParams(
            dimension_semantics=("parallel", "arbitrary", "arbitrary"),
            vmem_limit_bytes=vmem_limit),
        cost_estimate=pl.CostEstimate(
            flops=total, transcendentals=0,
            bytes_accessed=size_bytes + num_cores * 8 * 128 * 4),
    )(x2d)

    # ---------------- Pass 2: subtract mean (fully parallel stream) ---------
    out2d = pl.pallas_call(
        functools.partial(_subtract_kernel, inv_total=inv_total,
                          num_cores=num_cores),
        out_shape=jax.ShapeDtypeStruct((rows, lanes), orig_dtype),
        grid=(num_row_tiles, num_lane_tiles),
        in_specs=[pl.BlockSpec(memory_space=pltpu.MemorySpace.SMEM),
                  pl.BlockSpec((tile_rows, tile_lanes), lambda i, j: (i, j))],
        out_specs=pl.BlockSpec((tile_rows, tile_lanes), lambda i, j: (i, j)),
        compiler_params=pltpu.CompilerParams(
            dimension_semantics=("parallel", "parallel"),
            vmem_limit_bytes=vmem_limit),
        cost_estimate=pl.CostEstimate(
            flops=total, transcendentals=0,
            bytes_accessed=2 * size_bytes),
    )(sums, x2d)

    return out2d.reshape(orig_shape)


if __name__ == "__main__":
    key = jax.random.PRNGKey(0)

    # Main check: resident (single-read) path on the module's natural shape.
    x = jax.random.normal(key, (2, 4, 16, 16), dtype=jnp.float32)
    out = center_lay(x)
    jax.block_until_ready(out)
    ref = x - jnp.mean(x)
    assert out.shape == x.shape and out.dtype == x.dtype
    assert jnp.allclose(out, ref, atol=1e-5), "resident path mismatch"

    # Exercise the streaming two-pass path (per-core split, tail clamp,
    # last-tile row mask, lane-tiling fallback) by forcing tiny tile budgets.
    tiled_cases = [
        ((4, 8, 16, 16), 8 * 1024),   # 4 row tiles, even 2-core split, no masks
        ((9, 2, 16, 16), 8 * 1024),   # 3 row tiles: tail clamp + last-tile mask
        ((2, 4, 16, 16), 4 * 1024),   # lane-tiling fallback (2 lane tiles)
    ]
    for idx, (shape, tile_bytes) in enumerate(tiled_cases):
        kt = jax.random.fold_in(key, idx + 1)
        xt = jax.random.normal(kt, shape, dtype=jnp.float32)
        ot = center_lay(xt, target_tile_bytes=tile_bytes, force_tiled=True)
        jax.block_until_ready(ot)
        rt = xt - jnp.mean(xt)
        assert jnp.allclose(ot, rt, atol=1e-5), f"tiled path mismatch for {shape}"

    print("KERNEL_OK")
</pallas_src>

<mosaic_0001>
module attributes {stable_mosaic.version = 11 : i64} {
  func.func @_resident_kernel(%arg0: memref<8x256xf32, #tpu.memory_space<vmem>>, %arg1: memref<8x256xf32, #tpu.memory_space<vmem>>) attributes {dimension_semantics = [], scalar_prefetch = 0 : i64, scratch_operands = 0 : i64, tpu.core_type = #tpu.core_type<tc>} {
    %c0 = arith.constant 0 : index
    %c0_0 = arith.constant 0 : index
    %0 = vector.load %arg0[%c0, %c0_0] : memref<8x256xf32, #tpu.memory_space<vmem>>, vector<8x256xf32>
    %1 = vector.shape_cast %0 : vector<8x256xf32> to vector<1x8x256xf32>
    %cst = arith.constant dense<0.000000e+00> : vector<1xf32>
    %2 = vector.multi_reduction <add>, %1, %cst [1, 2] : vector<1x8x256xf32> to vector<1xf32>
    %3 = vector.shape_cast %2 : vector<1xf32> to vector<1x1x1xf32>
    %4 = vector.extract %3[0, 0, 0] : f32 from vector<1x1x1xf32>
    %cst_1 = arith.constant 4.8828125E-4 : f32
    %5 = arith.mulf %4, %cst_1 : f32
    %6 = vector.broadcast %5 : f32 to vector<8x256xf32>
    %7 = arith.subf %0, %6 : vector<8x256xf32>
    %c0_2 = arith.constant 0 : index
    %c0_3 = arith.constant 0 : index
    %8 = vector.load %arg1[%c0_2, %c0_3] : memref<8x256xf32, #tpu.memory_space<vmem>>, vector<8x256xf32>
    tpu.vector_store %arg1[%c0_2, %c0_3], %7 {strides = array<i32>} : memref<8x256xf32, #tpu.memory_space<vmem>>, vector<8x256xf32>,
    return
  }
}

</mosaic_0001>

<bundles_post_ra>
// kernel: tpu_custom_call.1
= control target key start
LH: loop header
LB: loop body
LE: loop exit
PB: predicated region body
PF: predicated region fallthrough
CT: control target
= control target key end

     0   :  { %6 = vsyncpa [#allocation3], 0  ;;  %s142_s0 = inlined_call_operand.hbm [shape: f32[8,256], index: 0, kind: input, shape index: {}]   ;;  %s143_s1 = inlined_call_operand.hbm [shape: f32[8,256], index: 1, kind: output, shape index: {}]  }
   0x1   :  { %7 = vsyncpa [#allocation4], 0  ;;  %s106_s6 = smov [#allocation2]   ;;  %s58_s10 = scalar_lea.hbm %s142_s0, 256 }
   0x2   :  { %s14_s7 = sshll.u32 %s106_s6, 4  ;;  %p59_p0 = scmp.ne.s32.totalorder %s142_s0, %s58_s10  ;;  %s15_s7 = int_to_ptr.vmem [resolvable:$true] %s14_s7 }
   0x3   :  { %p62_p1 = scmp.lt.u32.totalorder %s58_s10, %s142_s0 }
   0x5   :  { %p64_p2 = pnand %p62_p1, %p59_p0 }
   0x7   :  { %67 = shalt.err (!%p64_p2)
}
   0x8   :  { %s68_s15 = scalar_lea.vmem %s15_s7, 256  ;;  %p73_p4 = scmp.lt.s32.totalorder %s15_s7, %s15_s7 }
   0x9   :  { %p69_p3 = scmp.ne.s32.totalorder %s15_s7, %s68_s15  ;;  %p74_p5 = scmp.lt.s32.totalorder %s68_s15, %s68_s15 }
   0xb   :  { %p75_p6 = por %p74_p5, %p73_p4 }
   0xd   :  { %p76_p7 = pnand %p75_p6, %p69_p3 }
   0xf   :  { %79 = shalt.err (!%p76_p7)
}
  0x10   :  { %17 = dma.hbm_to_vmem [thread:$0]  %s142_s0, 256, %s15_s7, [#allocation3]  }
  0x11   :  { %102 = dma.done.wait [#allocation3], 256  }
  0x12   :  { %103 = vsyncadd [#allocation3], 4294967040  ;;  %v21_v0 = vld [vmem:[#allocation2] sm:$0xff]  ;;  %v22_v1 = vld [vmem:[#allocation2 + $0x8] sm:$0xff]  ;;  %s107_s20 = smov [#allocation5]  }
  0x13   :  { %v23_v2 = vadd.f32 %v22_v1, %v21_v0  ;;  %s45_s21 = sshll.u32 %s107_s20, 4  ;;  %s46_s21 = int_to_ptr.vmem [resolvable:$true] %s45_s21 }
  0x14   :  { %s80_s0 = scalar_lea.vmem %s46_s21, 256  ;;  %p85_p9 = scmp.lt.s32.totalorder %s46_s21, %s46_s21 }
  0x15   :  { %24 = vadd.xlane.f32.xlu0 %v23_v2  ;;  %p81_p8 = scmp.ne.s32.totalorder %s46_s21, %s80_s0  ;;  %p86_p10 = scmp.lt.s32.totalorder %s80_s0, %s80_s0 }
  0x17   :  { %p87_p11 = por %p86_p10, %p85_p9 }
  0x19   :  { %p88_p12 = pnand %p87_p11, %p81_p8 }
  0xa2   :  { %v25_v3 = vpop.xlane.xlu0 %24 }
  0xa3   :  { %v26_v4 = vrot.slane %v25_v3, 4 }
  0xa5   :  { %v27_v5 = vadd.f32 %v26_v4, %v25_v3 }
  0xa7   :  { %v28_v6 = vrot.slane %v27_v5, 2 }
  0xa9   :  { %v29_v7 = vadd.f32 %v28_v6, %v27_v5 }
  0xab   :  { %v30_v8 = vrot.slane %v29_v7, 1 }
  0xad   :  { %v31_v9 = vadd.f32 %v30_v8, %v29_v7 }
  0xaf   :  { %54 = vpush %v31_v9 }
  0xe0   :  { %s55_s18 = spop %54 }
  0xe1   :  { %s33_s19 = smul.f32 0.00048828125, %s55_s18 }
  0xe3   :  { %v34_v10 = vstv %s33_s19 }
  0xe4   :  { %v35_v11 = vsub.f32 %v21_v0, %v34_v10  ;;  %v36_v12 = vsub.f32 %v22_v1, %v34_v10 }
  0xe6   :  { %37 = vst [vmem:[#allocation5] sm:$0xff] %v35_v11  ;;  %38 = vst [vmem:[#allocation5 + $0x8] sm:$0xff] %v36_v12 }
  0xe7   :  { %91 = shalt.err (!%p88_p12)
}
  0xe8   :  { %s92_s24 = scalar_lea.hbm %s143_s1, 256 }
  0xe9   :  { %p93_p13 = scmp.ne.s32.totalorder %s143_s1, %s92_s24  ;;  %p96_p0 = scmp.lt.u32.totalorder %s92_s24, %s143_s1 }
  0xeb   :  { %p98_p1 = pnand %p96_p0, %p93_p13 }
  0xed   :  { %101 = shalt.err (!%p98_p1)
}
  0xee   :  { %48 = dma.vmem_to_hbm [thread:$0]  %s46_s21, 256, %s143_s1, [#allocation4]  }
  0xef   :  { %104 = dma.done.wait [#allocation4], 256  }
  0xf0   :  { %105 = vsyncadd [#allocation4], 4294967040 }
  0xf1   :  { %52 = vsyncpa [#allocation3], 1 }
  0xf2   :  { %53 = vsyncpa [#allocation4], 1 }

</bundles_post_ra>
